<compile_context>
chip_gen: v5e
topology: v5e:2x2
jax: 0.10.0
libtpu: 0.0.40
codegen_flags: <defaults>
</compile_context>

<pallas_src>
import jax
import jax.numpy as jnp
from jax.experimental import pallas as pl
from jax.experimental.pallas import tpu as pltpu


# ---------------------------------------------------------------------------
# Kernel bodies (the op is a memory-bound copy)
# ---------------------------------------------------------------------------

def _copy_kernel(x_ref, o_ref):
    # Input block already holds exactly the wanted columns: straight copy.
    o_ref[...] = x_ref[...]


def _slice_kernel(x_ref, o_ref):
    # Input block carries a few extra columns (up to the next 128 boundary);
    # keep only the first t_out.
    t_out = o_ref.shape[-1]
    o_ref[...] = x_ref[:, :t_out]


def _round_up(v: int, m: int) -> int:
    return ((v + m - 1) // m) * m


def _trim1d_pallas(x: jax.Array, trim: int, *,
                   target_block_bytes: int = 8 * 1024 * 1024) -> jax.Array:
    """Pallas implementation of x[:, :, :-trim] for (N, C, T) inputs."""
    n, c, t = x.shape
    t_out = t - trim
    rows = n * c

    # Collapse batch & channel: every (n, c) row is independent, so we want as
    # many rows as possible per DMA.
    x2 = x.reshape(rows, t)

    itemsize = jnp.dtype(x.dtype).itemsize
    # Sublane tile for this dtype: f32 -> 8, bf16 -> 16, int8/fp8 -> 32.
    sublane = max(8, 32 // itemsize)

    # Input fetch extent per row: if the kept length is lane-aligned fetch
    # exactly the kept columns (zero dead HBM reads); otherwise fetch only up
    # to the next 128 boundary (dead reads < 128 columns/row), clamped to T.
    if t_out % 128 == 0:
        in_t = t_out
    else:
        in_t = min(t, _round_up(t_out, 128))

    min_rows = min(rows, sublane)

    if min_rows * (in_t + t_out) * itemsize <= target_block_bytes:
        # ---------------- whole-row path: 1-D grid over row tiles ----------
        bytes_per_row = (in_t + t_out) * itemsize
        max_rows = max(1, target_block_bytes // bytes_per_row)
        row_block = min(rows, max_rows)
        if row_block < rows:
            # Full-extent blocks are exempt; partial ones must hit the
            # dtype's sublane tile.
            row_block = max(sublane, (row_block // sublane) * sublane)

        kernel = _copy_kernel if in_t == t_out else _slice_kernel
        out2 = pl.pallas_call(
            kernel,
            out_shape=jax.ShapeDtypeStruct((rows, t_out), x.dtype),
            grid=(pl.cdiv(rows, row_block),),
            in_specs=[pl.BlockSpec((row_block, in_t), lambda i: (i, 0))],
            out_specs=pl.BlockSpec((row_block, t_out), lambda i: (i, 0)),
            compiler_params=pltpu.CompilerParams(
                dimension_semantics=("parallel",),
                vmem_limit_bytes=32 * 1024 * 1024,
            ),
        )(x2)
    else:
        # ---------------- long-row path: 2-D (row, time) grid --------------
        # Time tile is a multiple of 128 so both input and output blocks
        # satisfy the lane rule even though t / t_out are not 128-aligned;
        # Pallas masks the partial edge blocks.
        budget_cols = target_block_bytes // max(1, 2 * min_rows * itemsize)
        time_block = max(128, (budget_cols // 128) * 128)
        time_block = min(time_block, _round_up(t_out, 128))

        bytes_per_row = 2 * time_block * itemsize
        max_rows = max(1, target_block_bytes // bytes_per_row)
        row_block = min(rows, max_rows)
        if row_block < rows:
            row_block = max(sublane, (row_block // sublane) * sublane)

        out2 = pl.pallas_call(
            _copy_kernel,
            out_shape=jax.ShapeDtypeStruct((rows, t_out), x.dtype),
            grid=(pl.cdiv(rows, row_block), pl.cdiv(t_out, time_block)),
            in_specs=[pl.BlockSpec((row_block, time_block),
                                   lambda i, j: (i, j))],
            out_specs=pl.BlockSpec((row_block, time_block),
                                   lambda i, j: (i, j)),
            compiler_params=pltpu.CompilerParams(
                dimension_semantics=("parallel", "parallel"),
                vmem_limit_bytes=32 * 1024 * 1024,
            ),
        )(x2)

    return out2.reshape(n, c, t_out)


def trim1d(x: jax.Array, trim: int, *, use_pallas: bool | None = None) -> jax.Array:
    """Equivalent of Trim1d(trim)(x) for x of shape (N, C, T)."""
    assert trim > 0, "Trim1d requires a positive trim amount"
    n, c, t = x.shape
    t_out = t - trim
    assert t_out > 0, "trim must be smaller than the time dimension"

    if use_pallas is None:
        nbytes = x.size * jnp.dtype(x.dtype).itemsize
        # Tiny inputs: a single XLA copy beats a pallas_call launch.
        # Sub-128 kept widths: masked partial stores make the plain slice
        # competitive, so route them to XLA as well (per perf review).
        use_pallas = (nbytes >= (1 << 20)) and (t_out >= 128)

    if not use_pallas:
        return x[:, :, :t_out]

    return _trim1d_pallas(x, trim)


if __name__ == "__main__":
    key = jax.random.PRNGKey(0)
    k0, k1, k2, k3, k4 = jax.random.split(key, 5)

    def check(x, trim, **kw):
        ref = x[:, :, :-trim]
        out = jax.block_until_ready(_trim1d_pallas(x, trim, **kw))
        assert out.shape == ref.shape, (out.shape, ref.shape)
        assert out.dtype == x.dtype
        assert jnp.array_equal(out, ref), "Pallas trim output mismatch"
        return out

    # Primary small example consistent with a conv1d output: (N, C, T).
    N, C, T, TRIM = 2, 4, 16, 3
    x = jax.random.normal(k0, (N, C, T), dtype=jnp.float32)
    check(x, TRIM)  # unaligned t_out=13, whole-row path, single grid step

    # Lane-aligned kept length -> copy kernel fetching only the kept columns.
    check(jax.random.normal(k1, (2, 8, 640), dtype=jnp.float32), 128)

    # Multi-step row grid (small per-block byte target forces row tiling).
    check(jax.random.normal(k2, (4, 16, 256), dtype=jnp.float32), 13,
          target_block_bytes=16 * 1024)

    # Long-row fallback: 2-D (row, time) grid with 128-column time tiles.
    check(jax.random.normal(k3, (2, 4, 1024), dtype=jnp.float32), 100,
          target_block_bytes=2 * 1024)

    # Packed dtype (bf16): sublane tile of 16 rows.
    check(jax.random.normal(k4, (2, 16, 384)).astype(jnp.bfloat16), 5)

    # Dispatching wrapper (plain XLA slice path for tiny inputs) keeps semantics.
    ref = x[:, :, :-TRIM]
    out2 = jax.block_until_ready(trim1d(x, TRIM))
    assert jnp.array_equal(out2, ref)

    print("KERNEL_OK")
</pallas_src>

<mosaic_0001>
module attributes {stable_mosaic.version = 11 : i64} {
  func.func @_slice_kernel(%arg0: i32, %arg1: memref<8x16xf32, #tpu.memory_space<vmem>>, %arg2: memref<8x13xf32, #tpu.memory_space<vmem>>) attributes {dimension_semantics = [#tpu.dimension_semantics<parallel>], iteration_bounds = array<i64: 1>, scalar_prefetch = 0 : i64, scratch_operands = 0 : i64, tpu.core_type = #tpu.core_type<tc>, window_params = [{transform_indices = @transform_0, window_bounds = array<i64: 8, 16>}, {transform_indices = @transform_1, window_bounds = array<i64: 8, 13>}]} {
    %c0 = arith.constant 0 : index
    %c0_0 = arith.constant 0 : index
    %0 = vector.load %arg1[%c0, %c0_0] : memref<8x16xf32, #tpu.memory_space<vmem>>, vector<8x13xf32>
    %c0_1 = arith.constant 0 : index
    %c0_2 = arith.constant 0 : index
    %1 = vector.load %arg2[%c0_1, %c0_2] : memref<8x13xf32, #tpu.memory_space<vmem>>, vector<8x13xf32>
    tpu.vector_store %arg2[%c0_1, %c0_2], %0 {strides = array<i32>} : memref<8x13xf32, #tpu.memory_space<vmem>>, vector<8x13xf32>,
    return
  }
  func.func @transform_0(%arg0: i32) -> (i32, i32) {
    %c0_i32 = arith.constant 0 : i32
    %c0_i32_0 = arith.constant 0 : i32
    return %arg0, %c0_i32 : i32, i32
  }
  func.func @transform_1(%arg0: i32) -> (i32, i32) {
    %c0_i32 = arith.constant 0 : i32
    %c0_i32_0 = arith.constant 0 : i32
    return %arg0, %c0_i32 : i32, i32
  }
}

</mosaic_0001>

<bundles_post_ra>
// kernel: tpu_custom_call.1
= control target key start
LH: loop header
LB: loop body
LE: loop exit
PB: predicated region body
PF: predicated region fallthrough
CT: control target
= control target key end

     0   :  { %6 = vsyncpa [#allocation3], 0  ;;  %s115_s0 = inlined_call_operand.hbm [shape: f32[8,16], index: 0, kind: input, shape index: {}]   ;;  %s116_s1 = inlined_call_operand.hbm [shape: f32[8,13], index: 1, kind: output, shape index: {}]  }
   0x1   :  { %7 = vsyncpa [#allocation4], 0  ;;  %s13_s8 = sshll.u32 %s115_s0, 4  ;;  %s97_s9 = smov [#allocation2]   ;;  %s14_s8 = int_to_ptr.hbm [resolvable:$true] %s13_s8 }
   0x2   :  { %s15_s10 = sshll.u32 %s97_s9, 4  ;;  %s16_s10 = int_to_ptr.vmem [resolvable:$true] %s15_s10 }
   0x3   :  { %18 = dma.hbm_to_vmem [thread:$0]  %s14_s8, 128, %s16_s10, [#allocation3]  }
   0x4   :  { %93 = dma.done.wait [#allocation3], 128  }
   0x5   :  { %94 = vsyncadd [#allocation3], 4294967168  ;;  %s98_s11 = smov [#allocation5]   ;;  %s33_s15 = sshll.u32 %s116_s1, 4  ;;  %vm24_vm0 = vcmask 105472   ;;  %v23_v0 = vld [vmem:[#allocation2] sm:$0xff]  ;;  %s34_s15 = int_to_ptr.hbm [resolvable:$true] %s33_s15 }
   0x6   :  { %s31_s12 = sshll.u32 %s98_s11, 4  ;;  %25 = vst.msk [vmem:[#allocation5] sm:$0xff] %vm24_vm0, %v23_v0  ;;  %s32_s12 = int_to_ptr.vmem [resolvable:$true] %s31_s12 }
   0x7   :  { %36 = dma.vmem_to_hbm [thread:$0]  %s32_s12, 128, %s34_s15, [#allocation4]  }
   0x8   :  { %95 = dma.done.wait [#allocation4], 128  }
   0x9   :  { %96 = vsyncadd [#allocation4], 4294967168 }
   0xa   :  { %41 = vsyncpa [#allocation3], 1 }
   0xb   :  { %42 = vsyncpa [#allocation4], 1 }

</bundles_post_ra>
